<compile_context>
chip_gen: v7x
topology: tpu7x:2x2x1
jax: 0.10.0
libtpu: 0.0.40
codegen_flags: <defaults>
</compile_context>

<pallas_src>
import functools
import math

import jax
import jax.numpy as jnp
from jax.experimental import pallas as pl
from jax.experimental.pallas import tpu as pltpu

LANE = 128


def mlp_kernel(x_ref, w1_ref, wh_ref, b_ref, o_ref):
    """One batch tile through all five layers.

    x_ref  : [tile_b, 784] f32   (cast to bf16 here, before the first dot)
    w1_ref : [784, 128]    bf16  (layer-1 weight, out dim padded to 128)
    wh_ref : [4, 128, 128] bf16  (layers 2..5 weights, in/out padded to 128)
    b_ref  : [5, 128]      f32   (all biases, padded to 128)
    o_ref  : [tile_b, 128] f32   (padded logits; columns >= 10 are exactly 0)
    """
    biases = b_ref[...]                      # (5, 128) f32, tiny, loaded once

    # Layer 1: bf16 MXU operands, f32 accumulation, f32 bias + ReLU.
    h = x_ref[...].astype(jnp.bfloat16)
    h = jnp.dot(h, w1_ref[...], preferred_element_type=jnp.float32)
    h = jnp.maximum(h + biases[0:1, :], 0.0).astype(jnp.bfloat16)

    # Layers 2..4 (ReLU) and layer 5 (no activation).  Static Python loop ->
    # fully unrolled chain of bf16 matmuls with f32 accumulation.
    for l in range(4):
        h = jnp.dot(h, wh_ref[l], preferred_element_type=jnp.float32)
        h = h + biases[l + 1:l + 2, :]
        if l < 3:
            h = jnp.maximum(h, 0.0).astype(jnp.bfloat16)

    o_ref[...] = h.astype(o_ref.dtype)


def _pad_to(n, m):
    return ((n + m - 1) // m) * m


def prepare_params(params):
    """One-time padding + bf16 cast of the 5 (W[in,out] f32, b[1,out] f32) pairs.

    Returns (w1 [784,128] bf16, wh [4,128,128] bf16, biases [5,128] f32).
    Padded weight columns / bias entries are zero, so the padded logit columns
    of the kernel output are exactly zero.  Call once; reuse across forwards.
    """
    assert len(params) == 5
    w1, b1 = params[0]
    k_in, h1 = w1.shape
    assert h1 <= LANE, "first hidden size must be <= 128 for the stacked-weight path"
    w1_p = jnp.zeros((k_in, LANE), jnp.bfloat16).at[:, :h1].set(
        w1.astype(jnp.bfloat16))

    wh = []
    biases = [jnp.zeros((LANE,), jnp.float32).at[:h1].set(
        b1.reshape(-1).astype(jnp.float32))]
    in_dim = h1
    for w, b in params[1:]:
        fin, fout = w.shape
        assert fin == in_dim
        assert fin <= LANE and fout <= LANE, (
            "hidden sizes must be <= 128 for the stacked-weight path")
        w_p = jnp.zeros((LANE, LANE), jnp.bfloat16).at[:fin, :fout].set(
            w.astype(jnp.bfloat16))
        b_p = jnp.zeros((LANE,), jnp.float32).at[:fout].set(
            b.reshape(-1).astype(jnp.float32))
        wh.append(w_p)
        biases.append(b_p)
        in_dim = fout
    return w1_p, jnp.stack(wh), jnp.stack(biases)


def _choose_tile_b(B):
    """Batch tile: big M for MXU occupancy, but never a 1-step grid for B>=16
    (v7x has 2 TensorCores; >=2 steps also gives DMA/compute overlap)."""
    if B % 256 == 0 and B >= 512:
        return 256
    if B % 128 == 0 and B >= 256:
        return 128
    if B % 16 == 0 and B >= 16:
        return B // 2            # grid=(2,), tile is a multiple of 8
    return B                     # single full-array block (always legal)


@functools.partial(jax.jit, static_argnums=(4,))
def mlp_forward(x, w1, wh, biases, num_classes):
    """x: [B, num_input] f32.  w1/wh/biases: output of prepare_params."""
    B, k_in = x.shape
    out_pad = wh.shape[-1]       # 128 (lane-dense padded class dim)
    tile_b = _choose_tile_b(B)
    assert B % tile_b == 0
    grid_b = B // tile_b

    flops = 2 * B * (w1.shape[0] * w1.shape[1]
                     + wh.shape[0] * wh.shape[1] * wh.shape[2])
    bytes_accessed = (x.size * 4 + w1.size * 2 + wh.size * 2
                      + biases.size * 4 + B * out_pad * 4)
    cost = pl.CostEstimate(flops=flops, transcendentals=0,
                           bytes_accessed=bytes_accessed)

    out_padded = pl.pallas_call(
        mlp_kernel,
        out_shape=jax.ShapeDtypeStruct((B, out_pad), jnp.float32),
        grid_spec=pl.GridSpec(
            grid=(grid_b,),
            in_specs=[
                # x: batch-tiled; last dim (784) equals the full array dim.
                pl.BlockSpec((tile_b, k_in), lambda i: (i, 0)),
                # Weights/biases: same block every step -> resident in VMEM.
                pl.BlockSpec(w1.shape, lambda i: (0, 0)),
                pl.BlockSpec(wh.shape, lambda i: (0, 0, 0)),
                pl.BlockSpec(biases.shape, lambda i: (0, 0)),
            ],
            out_specs=pl.BlockSpec((tile_b, out_pad), lambda i: (i, 0)),
        ),
        compiler_params=pltpu.CompilerParams(
            dimension_semantics=("parallel",),
            # ~1 MiB actually used; well inside every generation's scoped VMEM.
            vmem_limit_bytes=32 * 1024 * 1024,
        ),
        cost_estimate=cost,
    )(x, w1, wh, biases)

    # Padded weight cols / bias entries are zero -> columns >= num_classes are
    # exactly zero; slice the real logits inside the jit so XLA fuses it.
    return out_padded[:, :num_classes]


def init_params(key, layer_sizes):
    """Deterministic init mirroring nn.Linear's U(-1/sqrt(fan_in), 1/sqrt(fan_in))."""
    params = []
    for fan_in, fan_out in zip(layer_sizes[:-1], layer_sizes[1:]):
        key, kw, kb = jax.random.split(key, 3)
        bound = 1.0 / math.sqrt(fan_in)
        w = jax.random.uniform(kw, (fan_in, fan_out), jnp.float32, -bound, bound)
        b = jax.random.uniform(kb, (1, fan_out), jnp.float32, -bound, bound)
        params.append((w, b))
    return params


if __name__ == "__main__":
    # Module shapes: 28*28 input, hidden 128/64/64/32, 10 classes.
    # Small demo batch 128 -> tile_b=64, grid=(2,) parallel steps.
    num_input = 28 * 28
    layer_sizes = [num_input, 128, 64, 64, 32, 10]
    num_classes = layer_sizes[-1]
    batch = 128

    key = jax.random.PRNGKey(0)
    key, kx = jax.random.split(key)
    x = jax.random.normal(kx, (batch, num_input), jnp.float32)
    params = init_params(key, layer_sizes)

    # One-time pad + cast, hoisted out of the per-call path.
    w1_p, wh_p, b_p = prepare_params(params)

    out = mlp_forward(x, w1_p, wh_p, b_p, num_classes)
    out = jax.block_until_ready(out)
    assert out.shape == (batch, num_classes)

    # Reference in plain JAX along the same bf16-operand / f32-accumulate path.
    h = x.astype(jnp.bfloat16)
    for i, (w, b) in enumerate(params):
        h = jnp.dot(h, w.astype(jnp.bfloat16),
                    preferred_element_type=jnp.float32) + b
        if i < len(params) - 1:
            h = jnp.maximum(h, 0.0).astype(jnp.bfloat16)
    ref = h

    assert jnp.allclose(out, ref, atol=5e-2, rtol=5e-2), (
        float(jnp.max(jnp.abs(out - ref))))

    print("KERNEL_OK")
</pallas_src>

<mosaic_0001>
module attributes {stable_mosaic.version = 11 : i64} {
  func.func @mlp_kernel(%arg0: i32, %arg1: memref<64x784xf32, #tpu.memory_space<vmem>>, %arg2: memref<784x128xbf16, #tpu.memory_space<vmem>>, %arg3: memref<4x128x128xbf16, #tpu.memory_space<vmem>>, %arg4: memref<5x128xf32, #tpu.memory_space<vmem>>, %arg5: memref<64x128xf32, #tpu.memory_space<vmem>>) attributes {dimension_semantics = [#tpu.dimension_semantics<parallel>], iteration_bounds = array<i64: 2>, scalar_prefetch = 0 : i64, scratch_operands = 0 : i64, tpu.core_type = #tpu.core_type<tc>, window_params = [{transform_indices = @transform_0, window_bounds = array<i64: 64, 784>}, {pipeline_mode = #tpu.pipeline_mode<synchronous>, transform_indices = @transform_1, window_bounds = array<i64: 784, 128>}, {pipeline_mode = #tpu.pipeline_mode<synchronous>, transform_indices = @transform_2, window_bounds = array<i64: 4, 128, 128>}, {pipeline_mode = #tpu.pipeline_mode<synchronous>, transform_indices = @transform_3, window_bounds = array<i64: 5, 128>}, {transform_indices = @transform_4, window_bounds = array<i64: 64, 128>}]} {
    %c0 = arith.constant 0 : index
    %c0_0 = arith.constant 0 : index
    %0 = vector.load %arg4[%c0, %c0_0] : memref<5x128xf32, #tpu.memory_space<vmem>>, vector<5x128xf32>
    %c0_1 = arith.constant 0 : index
    %c0_2 = arith.constant 0 : index
    %1 = vector.load %arg1[%c0_1, %c0_2] : memref<64x784xf32, #tpu.memory_space<vmem>>, vector<64x784xf32>
    %2 = arith.truncf %1 : vector<64x784xf32> to vector<64x784xbf16>
    %c0_3 = arith.constant 0 : index
    %c0_4 = arith.constant 0 : index
    %3 = vector.load %arg2[%c0_3, %c0_4] : memref<784x128xbf16, #tpu.memory_space<vmem>>, vector<784x128xbf16>
    %cst = arith.constant dense<0.000000e+00> : vector<64x128xf32>
    %4 = tpu.matmul %2, %3, %cst {dimension_numbers = #tpu.dot_dimension_numbers<[1], [0], [0], [1], [0, 0, 1, 1], [], []>} : vector<64x784xbf16>, vector<784x128xbf16>, vector<64x128xf32> -> vector<64x128xf32>
    %5 = vector.extract_strided_slice %0 {offsets = [0, 0], sizes = [1, 128], strides = [1, 1]} : vector<5x128xf32> to vector<1x128xf32>
    %6 = vector.broadcast %5 : vector<1x128xf32> to vector<64x128xf32>
    %7 = arith.addf %4, %6 : vector<64x128xf32>
    %cst_5 = arith.constant 0.000000e+00 : f32
    %8 = vector.broadcast %cst_5 : f32 to vector<64x128xf32>
    %9 = arith.maximumf %7, %8 : vector<64x128xf32>
    %10 = arith.truncf %9 : vector<64x128xf32> to vector<64x128xbf16>
    %c0_6 = arith.constant 0 : index
    %c0_7 = arith.constant 0 : index
    %c0_8 = arith.constant 0 : index
    %11 = vector.load %arg3[%c0_6, %c0_7, %c0_8] : memref<4x128x128xbf16, #tpu.memory_space<vmem>>, vector<1x128x128xbf16>
    %12 = vector.shape_cast %11 : vector<1x128x128xbf16> to vector<128x128xbf16>
    %cst_9 = arith.constant dense<0.000000e+00> : vector<64x128xf32>
    %13 = tpu.matmul %10, %12, %cst_9 {dimension_numbers = #tpu.dot_dimension_numbers<[1], [0], [0], [1], [0, 0, 1, 1], [], []>} : vector<64x128xbf16>, vector<128x128xbf16>, vector<64x128xf32> -> vector<64x128xf32>
    %14 = vector.extract_strided_slice %0 {offsets = [1, 0], sizes = [1, 128], strides = [1, 1]} : vector<5x128xf32> to vector<1x128xf32>
    %15 = vector.broadcast %14 : vector<1x128xf32> to vector<64x128xf32>
    %16 = arith.addf %13, %15 : vector<64x128xf32>
    %cst_10 = arith.constant 0.000000e+00 : f32
    %17 = vector.broadcast %cst_10 : f32 to vector<64x128xf32>
    %18 = arith.maximumf %16, %17 : vector<64x128xf32>
    %19 = arith.truncf %18 : vector<64x128xf32> to vector<64x128xbf16>
    %c1 = arith.constant 1 : index
    %c0_11 = arith.constant 0 : index
    %c0_12 = arith.constant 0 : index
    %20 = vector.load %arg3[%c1, %c0_11, %c0_12] : memref<4x128x128xbf16, #tpu.memory_space<vmem>>, vector<1x128x128xbf16>
    %21 = vector.shape_cast %20 : vector<1x128x128xbf16> to vector<128x128xbf16>
    %cst_13 = arith.constant dense<0.000000e+00> : vector<64x128xf32>
    %22 = tpu.matmul %19, %21, %cst_13 {dimension_numbers = #tpu.dot_dimension_numbers<[1], [0], [0], [1], [0, 0, 1, 1], [], []>} : vector<64x128xbf16>, vector<128x128xbf16>, vector<64x128xf32> -> vector<64x128xf32>
    %23 = vector.extract_strided_slice %0 {offsets = [2, 0], sizes = [1, 128], strides = [1, 1]} : vector<5x128xf32> to vector<1x128xf32>
    %24 = vector.broadcast %23 : vector<1x128xf32> to vector<64x128xf32>
    %25 = arith.addf %22, %24 : vector<64x128xf32>
    %cst_14 = arith.constant 0.000000e+00 : f32
    %26 = vector.broadcast %cst_14 : f32 to vector<64x128xf32>
    %27 = arith.maximumf %25, %26 : vector<64x128xf32>
    %28 = arith.truncf %27 : vector<64x128xf32> to vector<64x128xbf16>
    %c2 = arith.constant 2 : index
    %c0_15 = arith.constant 0 : index
    %c0_16 = arith.constant 0 : index
    %29 = vector.load %arg3[%c2, %c0_15, %c0_16] : memref<4x128x128xbf16, #tpu.memory_space<vmem>>, vector<1x128x128xbf16>
    %30 = vector.shape_cast %29 : vector<1x128x128xbf16> to vector<128x128xbf16>
    %cst_17 = arith.constant dense<0.000000e+00> : vector<64x128xf32>
    %31 = tpu.matmul %28, %30, %cst_17 {dimension_numbers = #tpu.dot_dimension_numbers<[1], [0], [0], [1], [0, 0, 1, 1], [], []>} : vector<64x128xbf16>, vector<128x128xbf16>, vector<64x128xf32> -> vector<64x128xf32>
    %32 = vector.extract_strided_slice %0 {offsets = [3, 0], sizes = [1, 128], strides = [1, 1]} : vector<5x128xf32> to vector<1x128xf32>
    %33 = vector.broadcast %32 : vector<1x128xf32> to vector<64x128xf32>
    %34 = arith.addf %31, %33 : vector<64x128xf32>
    %cst_18 = arith.constant 0.000000e+00 : f32
    %35 = vector.broadcast %cst_18 : f32 to vector<64x128xf32>
    %36 = arith.maximumf %34, %35 : vector<64x128xf32>
    %37 = arith.truncf %36 : vector<64x128xf32> to vector<64x128xbf16>
    %c3 = arith.constant 3 : index
    %c0_19 = arith.constant 0 : index
    %c0_20 = arith.constant 0 : index
    %38 = vector.load %arg3[%c3, %c0_19, %c0_20] : memref<4x128x128xbf16, #tpu.memory_space<vmem>>, vector<1x128x128xbf16>
    %39 = vector.shape_cast %38 : vector<1x128x128xbf16> to vector<128x128xbf16>
    %cst_21 = arith.constant dense<0.000000e+00> : vector<64x128xf32>
    %40 = tpu.matmul %37, %39, %cst_21 {dimension_numbers = #tpu.dot_dimension_numbers<[1], [0], [0], [1], [0, 0, 1, 1], [], []>} : vector<64x128xbf16>, vector<128x128xbf16>, vector<64x128xf32> -> vector<64x128xf32>
    %41 = vector.extract_strided_slice %0 {offsets = [4, 0], sizes = [1, 128], strides = [1, 1]} : vector<5x128xf32> to vector<1x128xf32>
    %42 = vector.broadcast %41 : vector<1x128xf32> to vector<64x128xf32>
    %43 = arith.addf %40, %42 : vector<64x128xf32>
    %c0_22 = arith.constant 0 : index
    %c0_23 = arith.constant 0 : index
    %44 = vector.load %arg5[%c0_22, %c0_23] : memref<64x128xf32, #tpu.memory_space<vmem>>, vector<64x128xf32>
    tpu.vector_store %arg5[%c0_22, %c0_23], %43 {strides = array<i32>} : memref<64x128xf32, #tpu.memory_space<vmem>>, vector<64x128xf32>,
    return
  }
  func.func @transform_0(%arg0: i32) -> (i32, i32) {
    %c0_i32 = arith.constant 0 : i32
    %c0_i32_0 = arith.constant 0 : i32
    return %arg0, %c0_i32 : i32, i32
  }
  func.func @transform_1(%arg0: i32) -> (i32, i32) {
    %c0_i32 = arith.constant 0 : i32
    %c0_i32_0 = arith.constant 0 : i32
    %c0_i32_1 = arith.constant 0 : i32
    return %c0_i32, %c0_i32_0 : i32, i32
  }
  func.func @transform_2(%arg0: i32) -> (i32, i32, i32) {
    %c0_i32 = arith.constant 0 : i32
    %c0_i32_0 = arith.constant 0 : i32
    %c0_i32_1 = arith.constant 0 : i32
    %c0_i32_2 = arith.constant 0 : i32
    return %c0_i32, %c0_i32_0, %c0_i32_1 : i32, i32, i32
  }
  func.func @transform_3(%arg0: i32) -> (i32, i32) {
    %c0_i32 = arith.constant 0 : i32
    %c0_i32_0 = arith.constant 0 : i32
    %c0_i32_1 = arith.constant 0 : i32
    return %c0_i32, %c0_i32_0 : i32, i32
  }
  func.func @transform_4(%arg0: i32) -> (i32, i32) {
    %c0_i32 = arith.constant 0 : i32
    %c0_i32_0 = arith.constant 0 : i32
    return %arg0, %c0_i32 : i32, i32
  }
}

</mosaic_0001>

<bundles_post_ra>
// kernel: mlp_forward.1
= control target key start
LH: loop header
LB: loop body
LE: loop exit
PB: predicated region body
PF: predicated region fallthrough
CT: control target
= control target key end

     0   :  { %s2152_s15 = smov 0   ;;  %s2497_s0 = inlined_call_operand.vmem [shape: f32[128,784], index: 0, kind: input, shape index: {}]   ;;  %s2498_s1 = inlined_call_operand.vmem [shape: bf16[784,128], index: 1, kind: input, shape index: {}]   ;;  %s2499_s2 = inlined_call_operand.vmem [shape: bf16[4,128,128], index: 2, kind: input, shape index: {}]   ;;  %s2500_s3 = inlined_call_operand.vmem [shape: f32[5,128], index: 3, kind: input, shape index: {}]   ;;  %s2501_s4 = inlined_call_operand.vmem [shape: f32[128,128], index: 4, kind: output, shape index: {}]  }
   0x1 LB: > { %s1606_s16 = sadd.s32 4294967295, %s2125_s15   ;;  %p1610_p0 = scmp.ge.s32.totalorder %s2125_s15, 1  ;;  %s2125_s15 = sphi %s2152_s15, %s14_s15  }
   0x2   : > { %p164_p1 = scmp.lt.s32.totalorder %s2125_s15, 3 }
   0x4   : > { %p165_p2 = pnand %p1610_p0, %p164_p1 }
   0x5   : > { %v2038_v0 = vld [vmem:[%s2498_s1 + $0x40] sm:$0xff] (!%p165_p2)   ;;  %v2042_v4 = vld [vmem:[%s2498_s1 + $0x48] sm:$0xff] (!%p165_p2)   ;;  %v2046_v8 = vld [vmem:[%s2498_s1 + $0x50] sm:$0xff] (!%p165_p2)   ;;  %s1611_s21 = sshll.u32 (!%p165_p2), %s1606_s16, 3  ;;  %vm686_vm0 = vcmask (!%p165_p2), 130048  }
   0x6   : > { %168 = sbr.rel (%p165_p2) target bundleno = 1203 (0x4b3), region = 36  ;;  %v2039_v1 = vld [vmem:[%s2498_s1] sm:$0xff] (!%p165_p2)   ;;  %1750 = vmatprep.subr.bf16.mxu0 (!%p165_p2), %v2038_v0  ;;  %v2043_v5 = vld [vmem:[%s2498_s1 + $0x8] sm:$0xff] (!%p165_p2)   ;;  %v2047_v9 = vld [vmem:[%s2498_s1 + $0x10] sm:$0xff] (!%p165_p2)   ;;  %p192_p3 = scmp.lt.s32.totalorder (!%p165_p2), %s1611_s21, 15 }
   0x7   : > { %v2040_v2 = vld [vmem:[%s2498_s1 + $0xc0] sm:$0xff] (!%p165_p2)   ;;  %1751 = vmatpush3.bf16.msra.mxu0 (!%p165_p2), %v2039_v1  ;;  %v2044_v6 = vld [vmem:[%s2498_s1 + $0xc8] sm:$0xff] (!%p165_p2)   ;;  %v2048_v10 = vld [vmem:[%s2498_s1 + $0xd0] sm:$0xff] (!%p165_p2)  }
   0x8   : > { %v2041_v3 = vld [vmem:[%s2498_s1 + $0x80] sm:$0xff] (!%p165_p2)   ;;  %1790 = vmatprep.subr.bf16.mxu1 (!%p165_p2), %v2040_v2  ;;  %1752 = vmatprep.subr.bf16.mxu0 (!%p165_p2), %v2042_v4  ;;  %v2045_v7 = vld [vmem:[%s2498_s1 + $0x88] sm:$0xff] (!%p165_p2)   ;;  %v2049_v11 = vld [vmem:[%s2498_s1 + $0x90] sm:$0xff] (!%p165_p2)  }
   0x9   : > { %1791 = vmatpush3.bf16.msra.mxu1 (!%p165_p2), %v2041_v3  ;;  %v2050_v12 = vld [vmem:[%s2498_s1 + $0x58] sm:$0xff] (!%p165_p2)   ;;  %v2054_v16 = vld [vmem:[%s2498_s1 + $0x60] sm:$0xff] (!%p165_p2)   ;;  %v2058_v20 = vld [vmem:[%s2498_s1 + $0x68] sm:$0xff] (!%p165_p2)  }
   0xa   : > { %1792 = vmatprep.subr.bf16.mxu1 (!%p165_p2), %v2044_v6  ;;  %v2051_v13 = vld [vmem:[%s2498_s1 + $0x18] sm:$0xff] (!%p165_p2)   ;;  %v2055_v17 = vld [vmem:[%s2498_s1 + $0x20] sm:$0xff] (!%p165_p2)   ;;  %v2059_v21 = vld [vmem:[%s2498_s1 + $0x28] sm:$0xff] (!%p165_p2)  }
   0xb   : > { %1753 = vmatpush3.bf16.msra.mxu0 (!%p165_p2), %v2043_v5  ;;  %v2052_v14 = vld [vmem:[%s2498_s1 + $0xd8] sm:$0xff] (!%p165_p2)   ;;  %v2056_v18 = vld [vmem:[%s2498_s1 + $0xe0] sm:$0xff] (!%p165_p2)   ;;  %v2060_v22 = vld [vmem:[%s2498_s1 + $0xe8] sm:$0xff] (!%p165_p2)  }
   0xc   : > { %1754 = vmatprep.subr.bf16.mxu0 (!%p165_p2), %v2046_v8  ;;  %v2053_v15 = vld [vmem:[%s2498_s1 + $0x98] sm:$0xff] (!%p165_p2)   ;;  %v2057_v19 = vld [vmem:[%s2498_s1 + $0xa0] sm:$0xff] (!%p165_p2)   ;;  %v2061_v23 = vld [vmem:[%s2498_s1 + $0xa8] sm:$0xff] (!%p165_p2)  }
   0xd   : > { %1793 = vmatpush3.bf16.msra.mxu1 %v2045_v7  ;;  %s2503_s21 = smov (!%p192_p3, %s1611_s21), 15  ;;  %v2062_v24 = vld [vmem:[%s2498_s1 + $0x70] sm:$0xff]   ;;  %v2066_v28 = vld [vmem:[%s2498_s1 + $0x78] sm:$0xff]   ;;  %v2070_v38 = vld [vmem:[%s2498_s1 + $0x140] sm:$0xff]  }
   0xe   : > { %1794 = vmatprep.subr.bf16.mxu1 %v2048_v10  ;;  %s2029_s19 = smul.u32 56, %s2503_s21  ;;  %v2063_v25 = vld [vmem:[%s2498_s1 + $0x30] sm:$0xff]   ;;  %v2067_v29 = vld [vmem:[%s2498_s1 + $0x38] sm:$0xff]   ;;  %v2071_v42 = vld [vmem:[%s2498_s1 + $0x100] sm:$0xff]   ;;  %s1614_s18 = sshll.u32 %s2503_s21, 3 }
   0xf   : > { %1755 = vmatpush3.bf16.msra.mxu0 %v2047_v9  ;;  %v2064_v26 = vld [vmem:[%s2498_s1 + $0xf0] sm:$0xff]   ;;  %v2068_v30 = vld [vmem:[%s2498_s1 + $0xf8] sm:$0xff]   ;;  %v2072_v46 = vld [vmem:[%s2498_s1 + $0x148] sm:$0xff]   ;;  %s202_s22 = scalar_lea.vmem %s2501_s4, %s1614_s18 }
  0x10   : > { %1756 = vmatprep.subr.bf16.mxu0 %v2050_v12  ;;  %v2065_v27 = vld [vmem:[%s2498_s1 + $0xb0] sm:$0xff]   ;;  %s2255_s30 = scalar_lea.vmem %s2497_s0, %s2029_s19  ;;  %v2069_v34 = vld [vmem:[%s2498_s1 + $0xb8] sm:$0xff]   ;;  %v2073_v47 = vld [vmem:[%s2498_s1 + $0x108] sm:$0xff]  }
  0x11   : > { %1795 = vmatpush3.bf16.msra.mxu1 %v2049_v11  ;;  %v207_v31 = vld [vmem:[%s2255_s30 + $0x8] sm:$0xff]  ;;  %v214_v32 = vld [vmem:[%s2255_s30 + $0x40] sm:$0xff]  ;;  %v213_v36 = vld [vmem:[%s2255_s30 + $0x38] sm:$0xff] }
  0x12   : > { %1796 = vmatprep.subr.bf16.mxu1 %v2052_v14  ;;  %v263_v33 = vpack.c.bf16 %v214_v32, %v207_v31  ;;  %v206_v35 = vld [vmem:[%s2255_s30] sm:$0xff]  ;;  %v209_v39 = vld [vmem:[%s2255_s30 + $0x18] sm:$0xff]  ;;  %v216_v40 = vld [vmem:[%s2255_s30 + $0x50] sm:$0xff] }
  0x13   : > { %1757 = vmatpush3.bf16.msra.mxu0 %v2051_v13  ;;  %v262_v37 = vpack.c.bf16 %v213_v36, %v206_v35  ;;  %v265_v41 = vpack.c.bf16 %v216_v40, %v209_v39  ;;  %v208_v43 = vld [vmem:[%s2255_s30 + $0x10] sm:$0xff]  ;;  %v215_v44 = vld [vmem:[%s2255_s30 + $0x48] sm:$0xff]  ;;  %v221_v48 = vld [vmem:[%s2255_s30 + $0x78] sm:$0xff] }
  0x14   : > { %1758 = vmatprep.subr.bf16.mxu0 %v2054_v16  ;;  %731 = vmatprep.mubr.bf16.mxu0 %v263_v33  ;;  %v264_v45 = vpack.c.bf16 %v215_v44, %v208_v43  ;;  %v228_v49 = vld [vmem:[%s2255_s30 + $0xb0] sm:$0xff]  ;;  %v227_v51 = vld [vmem:[%s2255_s30 + $0xa8] sm:$0xff]  ;;  %v230_v56 = vld [vmem:[%s2255_s30 + $0xc0] sm:$0xff] }
  0x15   : > { %1797 = vmatpush3.bf16.msra.mxu1 %v2053_v15  ;;  %796 = vmatprep.mubr.bf16.mxu1 %v265_v41  ;;  %v220_v50 = vld [vmem:[%s2255_s30 + $0x70] sm:$0xff]  ;;  %v270_v52 = vpack.c.bf16 %v228_v49, %v221_v48  ;;  %v223_v55 = vld [vmem:[%s2255_s30 + $0x88] sm:$0xff]  ;;  %v222_v59 = vld [vmem:[%s2255_s30 + $0x80] sm:$0xff] }
  0x16   : > { %1798 = vmatprep.subr.bf16.mxu1 %v2056_v18  ;;  %v269_v53 = vpack.c.bf16 %v227_v51, %v220_v50  ;;  %v2074_v54 = vld [vmem:[%s2498_s1 + $0x150] sm:$0xff]   ;;  %v272_v57 = vpack.c.bf16 %v230_v56, %v223_v55  ;;  %v229_v60 = vld [vmem:[%s2255_s30 + $0xb8] sm:$0xff]  ;;  %v235_v0 = vld [vmem:[%s2255_s30 + $0xe8] sm:$0xff] }
  0x17   : > { %1759 = vmatpush3.bf16.msra.mxu0 %v2055_v17  ;;  %v2075_v58 = vld [vmem:[%s2498_s1 + $0x110] sm:$0xff]   ;;  %v271_v61 = vpack.c.bf16 %v229_v60, %v222_v59  ;;  %v2076_v62 = vld [vmem:[%s2498_s1 + $0x158] sm:$0xff]   ;;  %v242_v1 = vld [vmem:[%s2255_s30 + $0x120] sm:$0xff] }
  0x18   : > { %1760 = vmatprep.subr.bf16.mxu0 %v2058_v20  ;;  %v2077_v63 = vld [vmem:[%s2498_s1 + $0x118] sm:$0xff]   ;;  %v277_v2 = vpack.c.bf16 %v242_v1, %v235_v0  ;;  %v234_v3 = vld [vmem:[%s2255_s30 + $0xe0] sm:$0xff]  ;;  %v244_v8 = vld [vmem:[%s2255_s30 + $0x130] sm:$0xff] }
  0x19   : > { %1799 = vmatpush3.bf16.msra.mxu1 %v2057_v19  ;;  %v241_v4 = vld [vmem:[%s2255_s30 + $0x118] sm:$0xff]  ;;  %v2078_v5 = vld [vmem:[%s2498_s1 + $0x160] sm:$0xff]   ;;  %v236_v11 = vld [vmem:[%s2255_s30 + $0xf0] sm:$0xff] }
  0x1a   : > { %1800 = vmatprep.subr.bf16.mxu1 %v2060_v22  ;;  %v237_v6 = vld [vmem:[%s2255_s30 + $0xf8] sm:$0xff]  ;;  %v276_v7 = vpack.c.bf16 %v241_v4, %v234_v3  ;;  %v2079_v10 = vld [vmem:[%s2498_s1 + $0x120] sm:$0xff]   ;;  %v243_v12 = vld [vmem:[%s2255_s30 + $0x128] sm:$0xff] }
  0x1b   : > { %1761 = vmatpush3.bf16.msra.mxu0 %v2059_v21  ;;  %v279_v9 = vpack.c.bf16 %v244_v8, %v237_v6  ;;  %v2080_v13 = vld [vmem:[%s2498_s1 + $0x180] sm:$0xff]   ;;  %v278_v14 = vpack.c.bf16 %v243_v12, %v236_v11  ;;  %v2081_v15 = vld [vmem:[%s2498_s1 + $0x168] sm:$0xff]   ;;  %v249_v17 = vld [vmem:[%s2255_s30 + $0x158] sm:$0xff] }
  0x1c   : > { %1762 = vmatprep.subr.bf16.mxu0 %v2062_v24  ;;  %v2082_v16 = vld [vmem:[%s2498_s1 + $0x128] sm:$0xff]   ;;  %v256_v18 = vld [vmem:[%s2255_s30 + $0x190] sm:$0xff]  ;;  %v258_v24 = vld [vmem:[%s2255_s30 + $0x1a0] sm:$0xff] }
  0x1d   : > { %1801 = vmatpush3.bf16.msra.mxu1 %v2061_v23  ;;  %v248_v19 = vld [vmem:[%s2255_s30 + $0x150] sm:$0xff]  ;;  %v284_v20 = vpack.c.bf16 %v256_v18, %v249_v17  ;;  %v255_v21 = vld [vmem:[%s2255_s30 + $0x188] sm:$0xff]  ;;  %v2086_v33 = vld [vmem:[%s2498_s1 + $0x138] sm:$0xff]  }
  0x1e   : > { %1802 = vmatprep.subr.bf16.mxu1 %v2064_v26  ;;  %v2083_v22 = vld [vmem:[%s2498_s1 + $0x170] sm:$0xff]   ;;  %v251_v23 = vld [vmem:[%s2255_s30 + $0x168] sm:$0xff]  ;;  %v210_v35 = vld [vmem:[%s2255_s30 + $0x20] sm:$0xff] }
  0x1f   : > { %1763 = vmatpush3.bf16.msra.mxu0 %v2063_v25  ;;  %v283_v25 = vpack.c.bf16 %v255_v21, %v248_v19  ;;  %v286_v26 = vpack.c.bf16 %v258_v24, %v251_v23  ;;  %v211_v32 = vld [vmem:[%s2255_s30 + $0x28] sm:$0xff]  ;;  %v225_v41 = vld [vmem:[%s2255_s30 + $0x98] sm:$0xff]  ;;  %v226_v44 = vld [vmem:[%s2255_s30 + $0xa0] sm:$0xff]  ;;  %v388_v19 = vlaneseq }
  0x20   : > { %1764 = vmatprep.subr.bf16.mxu0 %v2066_v28  ;;  %v250_v28 = vld [vmem:[%s2255_s30 + $0x160] sm:$0xff]  ;;  %v219_v39 = vld [vmem:[%s2255_s30 + $0x68] sm:$0xff]  ;;  %v224_v50 = vld [vmem:[%s2255_s30 + $0x90] sm:$0xff] }
  0x21   : > { %1803 = vmatpush3.bf16.msra.mxu1 %v2065_v27  ;;  %v2084_v27 = vld [vmem:[%s2498_s1 + $0x130] sm:$0xff]   ;;  %v247_v48 = vld [vmem:[%s2255_s30 + $0x148] sm:$0xff]  ;;  %v254_v55 = vld [vmem:[%s2255_s30 + $0x180] sm:$0xff] }
  0x22   : > { %1804 = vmatprep.subr.bf16.mxu1 %v2068_v30  ;;  %v2085_v30 = vld [vmem:[%s2498_s1 + $0x178] sm:$0xff]   ;;  %v231_v51 = vld [vmem:[%s2255_s30 + $0xc8] sm:$0xff]  ;;  %v238_v59 = vld [vmem:[%s2255_s30 + $0x100] sm:$0xff] }
  0x23   : > { %1765 = vmatpush3.bf16.msra.mxu0 %v2067_v29  ;;  %v257_v29 = vld [vmem:[%s2255_s30 + $0x198] sm:$0xff]  ;;  %v259_v3 = vld [vmem:[%s2255_s30 + $0x1a8] sm:$0xff]  ;;  %v2093_v11 = vld [vmem:[%s2499_s2 + $0x30] sm:$0xff]  }
  0x24   : > { %1830 = vmatprep.subr.bf16.mxu0 %v2070_v38  ;;  %v285_v31 = vpack.c.bf16 %v257_v29, %v250_v28  ;;  %v212_v38 = vld [vmem:[%s2255_s30 + $0x30] sm:$0xff]  ;;  %v261_v56 = vld [vmem:[%s2255_s30 + $0x1b8] sm:$0xff]  ;;  %v2088_v6 = vld [vmem:[%s2499_s2 + $0x8] sm:$0xff]  }
  0x25   : > { %1805 = vmatpush3.bf16.msra.mxu1 %v2069_v34  ;;  %v218_v34 = vld [vmem:[%s2255_s30 + $0x60] sm:$0xff]  ;;  %v268_v40 = vpack.c.bf16 %v219_v39, %v212_v38  ;;  %v245_v60 = vld [vmem:[%s2255_s30 + $0x138] sm:$0xff]  ;;  %v2100_v18 = vld [vmem:[%s2499_s2 + $0x68] sm:$0xff]  }
  0x26   : > { %732 = vmatmul.mubr.bf16.vlgmr.msra.gmra.mrb[0].mxu0 %v262_v37  ;;  %1923 = vmatprep.subr.bf16.mxu1 %v2080_v13  ;;  %v267_v36 = vpack.c.bf16 %v218_v34, %v211_v32  ;;  %v217_v37 = vld [vmem:[%s2255_s30 + $0x58] sm:$0xff]  ;;  %v280_v0 = vpack.c.bf16 %v245_v60, %v238_v59  ;;  %v2099_v17 = vld [vmem:[%s2499_s2 + $0x60] sm:$0xff]  }
  0x27   : > { %1831 = vmatpush3.bf16.msra.mxu0 %v2071_v42  ;;  %739 = vmatprep.mubr.bf16.mxu0 %v270_v52  ;;  %v232_v42 = vld [vmem:[%s2255_s30 + $0xd0] sm:$0xff]  ;;  %v266_v43 = vpack.c.bf16 %v217_v37, %v210_v35  ;;  %v239_v52 = vld [vmem:[%s2255_s30 + $0x108] sm:$0xff]  ;;  %v2090_v8 = vld [vmem:[%s2499_s2 + $0x18] sm:$0xff]  }
  0x28   : > { %797 = vmatmul.mubr.bf16.vlgmr.msra.gmra.mrb[0].mxu1 %v264_v45  ;;  %1832 = vmatprep.subr.bf16.mxu0 %v2072_v46  ;;  %v233_v45 = vld [vmem:[%s2255_s30 + $0xd8] sm:$0xff]  ;;  %v274_v46 = vpack.c.bf16 %v232_v42, %v225_v41 }
  0x29   : > { %804 = vmatprep.mubr.bf16.mxu1 %v272_v57  ;;  %1924 = vmatpush3.bf16.msra.mxu1 %v2080_v13  ;;  %v275_v49 = vpack.c.bf16 %v233_v45, %v226_v44  ;;  %v273_v57 = vpack.c.bf16 %v231_v51, %v224_v50  ;;  %v2094_v12 = vld [vmem:[%s2499_s2 + $0x38] sm:$0xff]   ;;  %v2095_v13 = vld [vmem:[%s2499_s2 + $0x40] sm:$0xff]  }
  0x2a   : > { %1957 = vmatprep.subr.bf16.mxu1 %v2095_v13 }
  0x2b   : > { %1833 = vmatpush3.bf16.msra.mxu0 %v2073_v47  ;;  %v240_v47 = vld [vmem:[%s2255_s30 + $0x110] sm:$0xff] }
  0x2c   : > { %1834 = vmatprep.subr.bf16.mxu0 %v2074_v54  ;;  %v282_v54 = vpack.c.bf16 %v247_v48, %v240_v47 }
  0x2e   : > { %740 = vmatmul.mubr.bf16.gmra.mrb[4].mxu0 %v269_v53  ;;  %v246_v53 = vld [vmem:[%s2255_s30 + $0x140] sm:$0xff] }
  0x2f   : > { %1835 = vmatpush3.bf16.msra.mxu0 %v2075_v58  ;;  %747 = vmatprep.mubr.bf16.mxu0 %v277_v2  ;;  %v281_v58 = vpack.c.bf16 %v246_v53, %v239_v52  ;;  %v252_v2 = vld [vmem:[%s2255_s30 + $0x170] sm:$0xff] }
  0x30   : > { %1836 = vmatprep.subr.bf16.mxu0 %v2076_v62  ;;  %805 = vmatmul.mubr.bf16.gmra.mrb[4].mxu1 %v271_v61  ;;  %v289_v61 = vpack.c.bf16 %v261_v56, %v254_v55  ;;  %v253_v62 = vld [vmem:[%s2255_s30 + $0x178] sm:$0xff]  ;;  %v287_v4 = vpack.c.bf16 %v259_v3, %v252_v2 }
  0x31   : > { %812 = vmatprep.mubr.bf16.mxu1 %v279_v9  ;;  %v2091_v9 = vld [vmem:[%s2499_s2 + $0x20] sm:$0xff]  }
  0x33   : > { %1837 = vmatpush3.bf16.msra.mxu0 %v2077_v63  ;;  %v260_v63 = vld [vmem:[%s2255_s30 + $0x1b0] sm:$0xff] }
  0x34   : > { %1838 = vmatprep.subr.bf16.mxu0 %v2078_v5  ;;  %v288_v1 = vpack.c.bf16 %v260_v63, %v253_v62  ;;  %v2087_v5 = vld [vmem:[%s2499_s2] sm:$0xff]  }
  0x36   : > { %748 = vmatmul.mubr.bf16.gmra.mrb[8].mxu0 %v276_v7  ;;  %v2089_v7 = vld [vmem:[%s2499_s2 + $0x10] sm:$0xff]  }
  0x37   : > { %1839 = vmatpush3.bf16.msra.mxu0 %v2079_v10  ;;  %755 = vmatprep.mubr.bf16.mxu0 %v284_v20  ;;  %v2092_v10 = vld [vmem:[%s2499_s2 + $0x28] sm:$0xff]   ;;  %v2419_v20 = vshrl.u32 %v388_v19, 7 }
  0x38   : > { %1840 = vmatprep.subr.bf16.mxu0 %v2081_v15  ;;  %813 = vmatmul.mubr.bf16.gmra.mrb[8].mxu1 %v278_v14  ;;  %v2096_v14 = vld [vmem:[%s2499_s2 + $0x48] sm:$0xff]   ;;  %v2097_v15 = vld [vmem:[%s2499_s2 + $0x50] sm:$0xff]  }
  0x39   : > { %820 = vmatprep.mubr.bf16.mxu1 %v286_v26  ;;  %v390_v21 = vsub.s32 0, %v2419_v20 }
  0x3b   : > { %1841 = vmatpush3.bf16.msra.mxu0 %v2082_v16  ;;  %v2098_v16 = vld [vmem:[%s2499_s2 + $0x58] sm:$0xff]  }
  0x3c   : > { %1842 = vmatprep.subr.bf16.mxu0 %v2083_v22  ;;  %v2425_v22 = vld [vmem:[%s2500_s3] sm:$0x1f] }
  0x3d   : > { %v391_v24 = vrot.slane %v2425_v22, %v390_v21 }
  0x3e   : > { %756 = vmatmul.mubr.bf16.gmra.mrb[12].mxu0 %v283_v25 }
  0x3f   : > { %1843 = vmatpush3.bf16.msra.mxu0 %v2084_v27  ;;  %861 = vmatprep.mubr.bf16.mxu0 %v267_v36 }
  0x40   : > { %1844 = vmatprep.subr.bf16.mxu0 %v2085_v30  ;;  %821 = vmatmul.mubr.bf16.gmra.mrb[12].mxu1 %v285_v31 }
  0x41   : > { %1925 = vmatprep.mubr.msk.bf16.mxu1 %vm686_vm0, %v268_v40 }
  0x43   : > { %1845 = vmatpush3.bf16.msra.mxu0 %v2086_v33 }
  0x44   : > { %1933 = vmatprep.subr.bf16.mxu0 %v2087_v5 }
  0x46   : > { %862 = vmatmul.mubr.bf16.vlgmr.msra.gmra.mrb[16].mxu0 %v266_v43 }
  0x47   : > { %869 = vmatprep.mubr.bf16.mxu0 %v274_v46  ;;  %1934 = vmatpush3.bf16.msra.mxu0 %v2087_v5 }
  0x48   : > { %1926 = vmatmul.mubr.msk.bf16.vlgmr.msra.gmra.mrb[16].mxu1 %vm686_vm0, %v275_v49  ;;  %1935 = vmatprep.subr.bf16.mxu0 %v2088_v6 }
  0x49   : > { %1929 = vmatprep.mubr.msk.bf16.mxu1 %vm686_vm0, %v282_v54  ;;  %1958 = vmatpush3.bf16.msra.mxu1 %v2095_v13 }
  0x4a   : > { %1959 = vmatprep.subr.bf16.mxu1 %v2096_v14 }
  0x4b   : > { %1936 = vmatpush3.bf16.msra.mxu0 %v2088_v6 }
  0x4c   : > { %1937 = vmatprep.subr.bf16.mxu0 %v2089_v7 }
  0x4d   : > { %1960 = vmatpush3.bf16.msra.mxu1 %v2096_v14 }
  0x4e   : > { %870 = vmatmul.mubr.bf16.gmra.mrb[20].mxu0 %v273_v57  ;;  %1961 = vmatprep.subr.bf16.mxu1 %v2097_v15 }
  0x4f   : > { %877 = vmatprep.mubr.bf16.mxu0 %v281_v58  ;;  %1938 = vmatpush3.bf16.msra.mxu0 %v2089_v7 }
  0x50   : > { %1930 = vmatmul.mubr.msk.bf16.gmra.mrb[20].mxu1 %vm686_vm0, %v289_v61  ;;  %1939 = vmatprep.subr.bf16.mxu0 %v2090_v8 }
  0x51   : > { %1962 = vmatpush3.bf16.msra.mxu1 %v2097_v15 }
  0x52   : > { %1963 = vmatprep.subr.bf16.mxu1 %v2098_v16 }
  0x53   : > { %1940 = vmatpush3.bf16.msra.mxu0 %v2090_v8 }
  0x54   : > { %1941 = vmatprep.subr.bf16.mxu0 %v2091_v9 }
  0x55   : > { %1964 = vmatpush3.bf16.msra.mxu1 %v2098_v16 }
  0x56   : > { %878 = vmatmul.mubr.bf16.gmra.mrb[24].mxu0 %v280_v0  ;;  %1965 = vmatprep.subr.bf16.mxu1 %v2099_v17 }
  0x57   : > { %885 = vmatprep.mubr.bf16.mxu0 %v288_v1  ;;  %1942 = vmatpush3.bf16.msra.mxu0 %v2091_v9 }
  0x58   : > { %1943 = vmatprep.subr.bf16.mxu0 %v2092_v10 }
  0x59   : > { %1966 = vmatpush3.bf16.msra.mxu1 %v2099_v17 }
  0x5a   : > { %1967 = vmatprep.subr.bf16.mxu1 %v2100_v18 }
  0x5b   : > { %1944 = vmatpush3.bf16.msra.mxu0 %v2092_v10 }
  0x5c   : > { %1945 = vmatprep.subr.bf16.mxu0 %v2093_v11 }
  0x5d   : > { %1968 = vmatpush3.bf16.msra.mxu1 %v2100_v18 }
  0x5e   : > { %886 = vmatmul.mubr.bf16.gmra.mrb[28].mxu0 %v287_v4 }
  0x5f   : > { %1946 = vmatpush3.bf16.msra.mxu0 %v2093_v11 }
  0x60   : > { %1947 = vmatprep.subr.bf16.mxu0 %v2094_v12 }
  0x63   : > { %1948 = vmatpush3.bf16.msra.mxu0 %v2094_v12 }
  0xf9   : > { %v1766_v23 = vpop.f32.mrb[0].mxu0 }
  0xfa   : > { %v1767_v25 = vpop.f32.mrb[1].mxu0 }
  0xfb   : > { %v1768_v26 = vadd.f32 %v1767_v25, %v1766_v23  ;;  %v1769_v27 = vpop.f32.mrb[2].mxu0  ;;  %v1806_v28 = vpop.f32.mrb[0].mxu1 }
  0xfc   : > { %v1770_v29 = vpop.f32.mrb[3].mxu0  ;;  %v1807_v32 = vpop.f32.mrb[1].mxu1 }
  0xfd   : > { %v734_v30 = vadd.f32 %v1768_v26, %v391_v24  ;;  %v1771_v31 = vadd.f32 %v1770_v29, %v1769_v27  ;;  %v1808_v33 = vadd.f32 %v1807_v32, %v1806_v28  ;;  %v1809_v34 = vpop.f32.mrb[2].mxu1 }
  0xfe   : > { %v1810_v36 = vpop.f32.mrb[3].mxu1 }
  0xff   : > { %v737_v35 = vadd.f32 %v1771_v31, %v391_v24  ;;  %v799_v37 = vadd.f32 %v1808_v33, %v734_v30  ;;  %v1811_v38 = vadd.f32 %v1810_v36, %v1809_v34 }
 0x101   : > { %v1772_v39 = vpop.f32.mrb[4].mxu0  ;;  %v802_v40 = vadd.f32 %v1811_v38, %v737_v35 }
 0x102   : > { %v1773_v41 = vpop.f32.mrb[5].mxu0 }
 0x103   : > { %v1774_v42 = vadd.f32 %v1773_v41, %v1772_v39  ;;  %v1775_v43 = vpop.f32.mrb[6].mxu0  ;;  %v1812_v44 = vpop.f32.mrb[4].mxu1 }
 0x104   : > { %v1776_v45 = vpop.f32.mrb[7].mxu0  ;;  %v1813_v48 = vpop.f32.mrb[5].mxu1 }
 0x105   : > { %v742_v46 = vadd.f32 %v1774_v42, %v391_v24  ;;  %v1777_v47 = vadd.f32 %v1776_v45, %v1775_v43  ;;  %v1814_v49 = vadd.f32 %v1813_v48, %v1812_v44  ;;  %v1815_v50 = vpop.f32.mrb[6].mxu1 }
 0x106   : > { %v1816_v52 = vpop.f32.mrb[7].mxu1 }
 0x107   : > { %v745_v51 = vadd.f32 %v1777_v47, %v391_v24  ;;  %v807_v53 = vadd.f32 %v1814_v49, %v742_v46  ;;  %v1817_v54 = vadd.f32 %v1816_v52, %v1815_v50 }
 0x109   : > { %v1778_v55 = vpop.f32.mrb[8].mxu0  ;;  %v810_v56 = vadd.f32 %v1817_v54, %v745_v51 }
 0x10a   : > { %v1779_v57 = vpop.f32.mrb[9].mxu0 }
 0x10b   : > { %v1780_v58 = vadd.f32 %v1779_v57, %v1778_v55  ;;  %v1781_v59 = vpop.f32.mrb[10].mxu0  ;;  %v1818_v60 = vpop.f32.mrb[8].mxu1 }
 0x10c   : > { %v1782_v61 = vpop.f32.mrb[11].mxu0  ;;  %v1819_v0 = vpop.f32.mrb[9].mxu1 }
 0x10d   : > { %v750_v62 = vadd.f32 %v1780_v58, %v391_v24  ;;  %v1783_v63 = vadd.f32 %v1782_v61, %v1781_v59  ;;  %v1820_v1 = vadd.f32 %v1819_v0, %v1818_v60  ;;  %v1821_v2 = vpop.f32.mrb[10].mxu1 }
 0x10e   : > { %v1822_v4 = vpop.f32.mrb[11].mxu1 }
 0x10f   : > { %v753_v3 = vadd.f32 %v1783_v63, %v391_v24  ;;  %v815_v5 = vadd.f32 %v1820_v1, %v750_v62  ;;  %v1823_v6 = vadd.f32 %v1822_v4, %v1821_v2 }
 0x111   : > { %v1784_v7 = vpop.f32.mrb[12].mxu0  ;;  %v818_v8 = vadd.f32 %v1823_v6, %v753_v3 }
 0x112   : > { %v1785_v9 = vpop.f32.mrb[13].mxu0 }
 0x113   : > { %v1786_v10 = vadd.f32 %v1785_v9, %v1784_v7  ;;  %v1787_v11 = vpop.f32.mrb[14].mxu0  ;;  %v1824_v12 = vpop.f32.mrb[12].mxu1 }
 0x114   : > { %v1788_v13 = vpop.f32.mrb[15].mxu0  ;;  %v1825_v16 = vpop.f32.mrb[13].mxu1 }
 0x115   : > { %v758_v14 = vadd.f32 %v1786_v10, %v391_v24  ;;  %v1789_v15 = vadd.f32 %v1788_v13, %v1787_v11  ;;  %v1826_v17 = vadd.f32 %v1825_v16, %v1824_v12  ;;  %v1827_v18 = vpop.f32.mrb[14].mxu1 }
 0x116   : > { %v1828_v21 = vpop.f32.mrb[15].mxu1 }
 0x117   : > { %v761_v19 = vadd.f32 %v1789_v15, %v391_v24  ;;  %v823_v23 = vadd.f32 %v1826_v17, %v758_v14  ;;  %v1829_v25 = vadd.f32 %v1828_v21, %v1827_v18 }
 0x119   : > { %v1846_v26 = vpop.f32.mrb[16].mxu0  ;;  %v826_v27 = vadd.f32 %v1829_v25, %v761_v19 }
 0x11a   : > { %v1847_v28 = vpop.f32.mrb[17].mxu0 }
 0x11b   : > { %v1848_v29 = vadd.f32 %v1847_v28, %v1846_v26  ;;  %v1849_v30 = vpop.f32.mrb[18].mxu0  ;;  %v1927_v32 = vpop.f32.mrb[16].mxu1  ;;  %v2102_v28 = vld [vmem:[%s2499_s2 + $0x78] sm:$0xff]  }
 0x11c   : > { %v1850_v31 = vpop.f32.mrb[19].mxu0  ;;  %v928_v35 = vpop.f32.mrb[17].mxu1 }
 0x11d   : > { %v1851_v33 = vadd.f32 %v1850_v31, %v1849_v30  ;;  %v864_v34 = vadd.f32 %v1848_v29, %v799_v37  ;;  %v1928_v36 = vpop.f32.mrb[18].mxu1  ;;  %v2105_v29 = vld [vmem:[%s2499_s2 + $0x90] sm:$0xff]   ;;  %v2106_v30 = vld [vmem:[%s2499_s2 + $0x98] sm:$0xff]   ;;  %v2107_v31 = vld [vmem:[%s2499_s2 + $0xa0] sm:$0xff]  }
 0x11e   : > { %v931_v41 = vpop.f32.mrb[19].mxu1 }
 0x11f   : > { %v929_v38 = vadd.f32 %v928_v35, %v864_v34  ;;  %v867_v39 = vadd.f32 %v1851_v33, %v802_v40  ;;  %v989_v33 = vsub.s32 1, %v2419_v20 }
 0x121   : > { %v932_v42 = vadd.f32 %v931_v41, %v867_v39  ;;  %v1852_v43 = vpop.f32.mrb[20].mxu0  ;;  %v959_v44 = vmax.f32 %v929_v38, 0.0  ;;  %v990_v34 = vrot.slane %v2425_v22, %v989_v33 }
 0x122   : > { %v1853_v24 = vpop.f32.mrb[21].mxu0 }
 0x123   : > { %v960_v45 = vmax.f32 %v932_v42, 0.0  ;;  %v1854_v46 = vadd.f32 %v1853_v24, %v1852_v43  ;;  %v1855_v47 = vpop.f32.mrb[22].mxu0  ;;  %v1931_v49 = vpop.f32.mrb[20].mxu1 }
 0x124   : > { %v1856_v48 = vpop.f32.mrb[23].mxu0  ;;  %v944_v54 = vpop.f32.mrb[21].mxu1 }
 0x125   : > { %v967_v50 = vpack.c.bf16 %v960_v45, %v959_v44  ;;  %v872_v51 = vadd.f32 %v1854_v46, %v807_v53  ;;  %v1857_v52 = vadd.f32 %v1856_v48, %v1855_v47  ;;  %v1932_v55 = vpop.f32.mrb[22].mxu1 }
 0x126   : > { %v947_v58 = vpop.f32.mrb[23].mxu1 }
 0x127   : > { %v937_v37 = vadd.f32 %v1927_v32, %v872_v51  ;;  %v875_v57 = vadd.f32 %v1857_v52, %v810_v56  ;;  %1949 = vmatprep.mubr.bf16.mxu0 %v967_v50  ;;  %v2108_v32 = vld [vmem:[%s2499_s2 + $0xa8] sm:$0xff]  }
 0x129   : > { %v940_v40 = vadd.f32 %v1928_v36, %v875_v57  ;;  %v1858_v59 = vpop.f32.mrb[24].mxu0  ;;  %v961_v61 = vmax.f32 %v937_v37, 0.0 }
 0x12a   : > { %v1859_v60 = vpop.f32.mrb[25].mxu0 }
 0x12b   : > { %v962_v62 = vmax.f32 %v940_v40, 0.0  ;;  %v1860_v63 = vadd.f32 %v1859_v60, %v1858_v59  ;;  %v1861_v0 = vpop.f32.mrb[26].mxu0 }
 0x12c   : > { %v1862_v1 = vpop.f32.mrb[27].mxu0 }
 0x12d   : > { %v968_v2 = vpack.c.bf16 %v962_v62, %v961_v61  ;;  %v1863_v3 = vadd.f32 %v1862_v1, %v1861_v0  ;;  %v880_v4 = vadd.f32 %v1860_v63, %v815_v5  ;;  %v2109_v0 = vld [vmem:[%s2499_s2 + $0xb0] sm:$0xff]   ;;  %v2110_v1 = vld [vmem:[%s2499_s2 + $0xb8] sm:$0xff]  }
 0x12f   : > { %v945_v6 = vadd.f32 %v944_v54, %v880_v4  ;;  %1950 = vmatmul.mubr.bf16.vlgmr.msra.gmra.mrb[32].mxu0 %v968_v2  ;;  %v883_v53 = vadd.f32 %v1863_v3, %v818_v8  ;;  %v2101_v8 = vld [vmem:[%s2499_s2 + $0x70] sm:$0xff]   ;;  %v2111_v2 = vld [vmem:[%s2499_s2 + $0xc0] sm:$0xff]   ;;  %v2112_v3 = vld [vmem:[%s2499_s2 + $0xc8] sm:$0xff]  }
 0x130   : > { %1969 = vmatprep.subr.bf16.mxu1 %v2101_v8  ;;  %v2113_v4 = vld [vmem:[%s2499_s2 + $0xd0] sm:$0xff]  }
 0x131   : > { %v948_v7 = vadd.f32 %v947_v58, %v883_v53  ;;  %v1864_v9 = vpop.f32.mrb[28].mxu0  ;;  %v963_v56 = vmax.f32 %v945_v6, 0.0  ;;  %1970 = vmatpush3.bf16.msra.mxu1 %v2101_v8  ;;  %v2114_v6 = vld [vmem:[%s2499_s2 + $0xd8] sm:$0xff]   ;;  %v2115_v53 = vld [vmem:[%s2499_s2 + $0xe0] sm:$0xff]  }
 0x132   : > { %v1865_v10 = vpop.f32.mrb[29].mxu0  ;;  %1971 = vmatprep.subr.bf16.mxu1 %v2102_v28 }
 0x133   : > { %v964_v11 = vmax.f32 %v948_v7, 0.0  ;;  %v1866_v12 = vadd.f32 %v1865_v10, %v1864_v9  ;;  %v1867_v13 = vpop.f32.mrb[30].mxu0  ;;  %v2116_v7 = vld [vmem:[%s2499_s2 + $0xe8] sm:$0xff]   ;;  %v1135_v9 = vsub.s32 2, %v2419_v20 }
 0x134   : > { %v1868_v14 = vpop.f32.mrb[31].mxu0 }
 0x135   : > { %v969_v15 = vpack.c.bf16 %v964_v11, %v963_v56  ;;  %v888_v16 = vadd.f32 %v1866_v12, %v823_v23  ;;  %v1869_v17 = vadd.f32 %v1868_v14, %v1867_v13  ;;  %1972 = vmatpush3.bf16.msra.mxu1 %v2102_v28  ;;  %v2103_v23 = vld [vmem:[%s2499_s2 + $0x80] sm:$0xff]   ;;  %v1136_v10 = vrot.slane %v2425_v22, %v1135_v9 }
 0x136   : > { %1981 = vmatprep.subr.bf16.mxu0 %v2103_v23  ;;  %2005 = vmatprep.subr.bf16.mxu1 %v2111_v2  ;;  %v1427_v9 = vsub.s32 4, %v2419_v20 }
 0x137   : > { %v953_v18 = vadd.f32 %v1931_v49, %v888_v16  ;;  %v891_v19 = vadd.f32 %v1869_v17, %v826_v27  ;;  %1953 = vmatprep.mubr.bf16.mxu0 %v969_v15  ;;  %v2104_v27 = vld [vmem:[%s2499_s2 + $0x88] sm:$0xff]   ;;  %1982 = vmatpush3.bf16.msra.mxu0 %v2103_v23 }
 0x138   : > { %1983 = vmatprep.subr.bf16.mxu0 %v2104_v27 }
 0x139   : > { %v956_v21 = vadd.f32 %v1932_v55, %v891_v19  ;;  %v965_v25 = vmax.f32 %v953_v18, 0.0 }
 0x13b   : > { %v966_v5 = vmax.f32 %v956_v21, 0.0  ;;  %1984 = vmatpush3.bf16.msra.mxu0 %v2104_v27 }
 0x13c   : > { %1985 = vmatprep.subr.bf16.mxu0 %v2105_v29 }
 0x13d   : > { %v970_v26 = vpack.c.bf16 %v966_v5, %v965_v25 }
 0x13f   : > { %1954 = vmatmul.mubr.bf16.gmra.mrb[36].mxu0 %v970_v26 }
 0x140   : > { %1986 = vmatpush3.bf16.msra.mxu0 %v2105_v29 }
 0x141   : > { %1987 = vmatprep.subr.bf16.mxu0 %v2106_v30 }
 0x144   : > { %1988 = vmatpush3.bf16.msra.mxu0 %v2106_v30 }
 0x145   : > { %1989 = vmatprep.subr.bf16.mxu0 %v2107_v31 }
 0x148   : > { %1990 = vmatpush3.bf16.msra.mxu0 %v2107_v31 }
 0x149   : > { %1991 = vmatprep.subr.bf16.mxu0 %v2108_v32 }
 0x14c   : > { %1992 = vmatpush3.bf16.msra.mxu0 %v2108_v32 }
 0x14d   : > { %1993 = vmatprep.subr.bf16.mxu0 %v2109_v0 }
 0x150   : > { %1994 = vmatpush3.bf16.msra.mxu0 %v2109_v0 }
 0x151   : > { %1995 = vmatprep.subr.bf16.mxu0 %v2110_v1 }
 0x154   : > { %1996 = vmatpush3.bf16.msra.mxu0 %v2110_v1 }
 0x202   : > { %v1951_v35 = vpop.f32.mrb[32].mxu0 }
 0x203   : > { %v1082_v36 = vadd.f32 %v1951_v35, %v990_v34  ;;  %v1073_v38 = vpop.f32.mrb[33].mxu0 }
 0x204   : > { %v1074_v39 = vadd.f32 %v1073_v38, %v990_v34  ;;  %v1952_v41 = vpop.f32.mrb[34].mxu0 }
 0x205   : > { %v1085_v42 = vadd.f32 %v1952_v41, %v990_v34  ;;  %v1076_v43 = vpop.f32.mrb[35].mxu0  ;;  %v1106_v44 = vmax.f32 %v1082_v36, 0.0  ;;  %v2117_v41 = vld [vmem:[%s2499_s2 + $0xf0] sm:$0xff]  }
 0x206   : > { %v1077_v24 = vadd.f32 %v1076_v43, %v990_v34  ;;  %v1104_v46 = vmax.f32 %v1074_v39, 0.0  ;;  %v1281_v43 = vsub.s32 3, %v2419_v20 }
 0x207   : > { %v1107_v45 = vmax.f32 %v1085_v42, 0.0  ;;  %v2118_v42 = vld [vmem:[%s2499_s2 + $0xf8] sm:$0xff]  }
 0x208   : > { %v1105_v47 = vmax.f32 %v1077_v24, 0.0  ;;  %v1282_v24 = vrot.slane %v2425_v22, %v1281_v43 }
 0x209   : > { %v1113_v48 = vpack.c.bf16 %v1107_v45, %v1106_v44 }
 0x20a   : > { %v1112_v49 = vpack.c.bf16 %v1105_v47, %v1104_v46 }
 0x20c   : > { %1973 = vmatprep.mubr.bf16.mxu1 %v1112_v49 }
 0x20d   : > { %1974 = vmatmul.mubr.bf16.vlgmr.msra.gmra.mrb[24].mxu1 %v1113_v48 }
 0x20e   : > { %2006 = vmatpush3.bf16.msra.mxu1 %v2111_v2 }
 0x20f   : > { %2007 = vmatprep.subr.bf16.mxu1 %v2112_v3 }
 0x212   : > { %v1955_v50 = vpop.f32.mrb[36].mxu0  ;;  %2008 = vmatpush3.bf16.msra.mxu1 %v2112_v3 }
 0x213   : > { %v1098_v51 = vadd.f32 %v1955_v50, %v990_v34  ;;  %v1089_v52 = vpop.f32.mrb[37].mxu0  ;;  %2009 = vmatprep.subr.bf16.mxu1 %v2113_v4 }
 0x214   : > { %v1090_v54 = vadd.f32 %v1089_v52, %v990_v34  ;;  %v1956_v55 = vpop.f32.mrb[38].mxu0 }
 0x215   : > { %v1101_v37 = vadd.f32 %v1956_v55, %v990_v34  ;;  %v1092_v57 = vpop.f32.mrb[39].mxu0  ;;  %v1110_v40 = vmax.f32 %v1098_v51, 0.0 }
 0x216   : > { %v1093_v58 = vadd.f32 %v1092_v57, %v990_v34  ;;  %v1108_v60 = vmax.f32 %v1090_v54, 0.0  ;;  %2010 = vmatpush3.bf16.msra.mxu1 %v2113_v4 }
 0x217   : > { %v1111_v59 = vmax.f32 %v1101_v37, 0.0  ;;  %2011 = vmatprep.subr.bf16.mxu1 %v2114_v6 }
 0x218   : > { %v1109_v61 = vmax.f32 %v1093_v58, 0.0 }
 0x219   : > { %v1115_v62 = vpack.c.bf16 %v1111_v59, %v1110_v40 }
 0x21a   : > { %v1114_v63 = vpack.c.bf16 %v1109_v61, %v1108_v60  ;;  %2012 = vmatpush3.bf16.msra.mxu1 %v2114_v6 }
 0x21b   : > { %2013 = vmatprep.subr.bf16.mxu1 %v2115_v53 }
 0x21c   : > { %1977 = vmatprep.mubr.bf16.mxu1 %v1114_v63 }
 0x21d   : > { %1978 = vmatmul.mubr.bf16.gmra.mrb[28].mxu1 %v1115_v62 }
 0x21e   : > { %2014 = vmatpush3.bf16.msra.mxu1 %v2115_v53 }
 0x21f   : > { %2015 = vmatprep.subr.bf16.mxu1 %v2116_v7 }
 0x222   : > { %2016 = vmatpush3.bf16.msra.mxu1 %v2116_v7 }
 0x223   : > { %2017 = vmatprep.subr.bf16.mxu1 %v2117_v41 }
 0x226   : > { %2018 = vmatpush3.bf16.msra.mxu1 %v2117_v41 }
 0x227   : > { %2019 = vmatprep.subr.bf16.mxu1 %v2118_v42 }
 0x22a   : > { %2020 = vmatpush3.bf16.msra.mxu1 %v2118_v42 }
 0x2e0   : > { %v1975_v56 = vpop.f32.mrb[24].mxu1 }
 0x2e1   : > { %v1228_v11 = vadd.f32 %v1975_v56, %v1136_v10  ;;  %v1219_v12 = vpop.f32.mrb[25].mxu1 }
 0x2e2   : > { %v1220_v13 = vadd.f32 %v1219_v12, %v1136_v10  ;;  %v1976_v14 = vpop.f32.mrb[26].mxu1 }
 0x2e3   : > { %v1231_v15 = vadd.f32 %v1976_v14, %v1136_v10  ;;  %v1222_v16 = vpop.f32.mrb[27].mxu1  ;;  %v1252_v18 = vmax.f32 %v1228_v11, 0.0 }
 0x2e4   : > { %v1223_v17 = vadd.f32 %v1222_v16, %v1136_v10  ;;  %v1250_v21 = vmax.f32 %v1220_v13, 0.0 }
 0x2e5   : > { %v1253_v19 = vmax.f32 %v1231_v15, 0.0 }
 0x2e6   : > { %v1251_v25 = vmax.f32 %v1223_v17, 0.0 }
 0x2e7   : > { %v1259_v5 = vpack.c.bf16 %v1253_v19, %v1252_v18 }
 0x2e8   : > { %v1258_v26 = vpack.c.bf16 %v1251_v25, %v1250_v21 }
 0x2ea   : > { %1997 = vmatprep.mubr.bf16.mxu0 %v1258_v26 }
 0x2eb   : > { %1998 = vmatmul.mubr.bf16.vlgmr.msra.gmra.mrb[40].mxu0 %v1259_v5 }
 0x2f0   : > { %v1979_v8 = vpop.f32.mrb[28].mxu1 }
 0x2f1   : > { %v1244_v28 = vadd.f32 %v1979_v8, %v1136_v10  ;;  %v1235_v23 = vpop.f32.mrb[29].mxu1 }
 0x2f2   : > { %v1236_v27 = vadd.f32 %v1235_v23, %v1136_v10  ;;  %v1980_v29 = vpop.f32.mrb[30].mxu1 }
 0x2f3   : > { %v1247_v30 = vadd.f32 %v1980_v29, %v1136_v10  ;;  %v1238_v31 = vpop.f32.mrb[31].mxu1  ;;  %v1256_v33 = vmax.f32 %v1244_v28, 0.0 }
 0x2f4   : > { %v1239_v32 = vadd.f32 %v1238_v31, %v1136_v10  ;;  %v1254_v35 = vmax.f32 %v1236_v27, 0.0  ;;  %v1428_v10 = vrot.slane %v2425_v22, %v1427_v9 }
 0x2f5   : > { %v1257_v34 = vmax.f32 %v1247_v30, 0.0 }
 0x2f6   : > { %v1255_v36 = vmax.f32 %v1239_v32, 0.0 }
 0x2f7   : > { %v1261_v38 = vpack.c.bf16 %v1257_v34, %v1256_v33 }
 0x2f8   : > { %v1260_v39 = vpack.c.bf16 %v1255_v36, %v1254_v35 }
 0x2fa   : > { %2001 = vmatprep.mubr.bf16.mxu0 %v1260_v39 }
 0x2fb   : > { %2002 = vmatmul.mubr.bf16.gmra.mrb[44].mxu0 %v1261_v38 }
 0x3be   : > { %v1999_v44 = vpop.f32.mrb[40].mxu0 }
 0x3bf   : > { %v1374_v45 = vadd.f32 %v1999_v44, %v1282_v24  ;;  %v1365_v46 = vpop.f32.mrb[41].mxu0 }
 0x3c0   : > { %v1366_v47 = vadd.f32 %v1365_v46, %v1282_v24  ;;  %v2000_v48 = vpop.f32.mrb[42].mxu0 }
 0x3c1   : > { %v1377_v49 = vadd.f32 %v2000_v48, %v1282_v24  ;;  %v1368_v50 = vpop.f32.mrb[43].mxu0  ;;  %v1398_v52 = vmax.f32 %v1374_v45, 0.0 }
 0x3c2   : > { %v1369_v51 = vadd.f32 %v1368_v50, %v1282_v24  ;;  %v1396_v55 = vmax.f32 %v1366_v47, 0.0 }
 0x3c3   : > { %v1399_v54 = vmax.f32 %v1377_v49, 0.0 }
 0x3c4   : > { %v1397_v37 = vmax.f32 %v1369_v51, 0.0 }
 0x3c5   : > { %v1405_v57 = vpack.c.bf16 %v1399_v54, %v1398_v52 }
 0x3c6   : > { %v1404_v58 = vpack.c.bf16 %v1397_v37, %v1396_v55 }
 0x3c8   : > { %2021 = vmatprep.mubr.bf16.mxu1 %v1404_v58 }
 0x3c9   : > { %2022 = vmatmul.mubr.bf16.vlgmr.msra.gmra.mrb[32].mxu1 %v1405_v57 }
 0x3ce   : > { %v2003_v40 = vpop.f32.mrb[44].mxu0 }
 0x3cf   : > { %v1390_v59 = vadd.f32 %v2003_v40, %v1282_v24  ;;  %v1381_v60 = vpop.f32.mrb[45].mxu0 }
 0x3d0   : > { %v1382_v61 = vadd.f32 %v1381_v60, %v1282_v24  ;;  %v2004_v62 = vpop.f32.mrb[46].mxu0 }
 0x3d1   : > { %v1393_v63 = vadd.f32 %v2004_v62, %v1282_v24  ;;  %v1384_v0 = vpop.f32.mrb[47].mxu0  ;;  %v1402_v2 = vmax.f32 %v1390_v59, 0.0 }
 0x3d2   : > { %v1385_v1 = vadd.f32 %v1384_v0, %v1282_v24  ;;  %v1400_v4 = vmax.f32 %v1382_v61, 0.0 }
 0x3d3   : > { %v1403_v3 = vmax.f32 %v1393_v63, 0.0 }
 0x3d4   : > { %v1401_v6 = vmax.f32 %v1385_v1, 0.0 }
 0x3d5   : > { %v1407_v53 = vpack.c.bf16 %v1403_v3, %v1402_v2 }
 0x3d6   : > { %v1406_v7 = vpack.c.bf16 %v1401_v6, %v1400_v4 }
 0x3d8   : > { %2025 = vmatprep.mubr.bf16.mxu1 %v1406_v7 }
 0x3d9   : > { %2026 = vmatmul.mubr.bf16.gmra.mrb[36].mxu1 %v1407_v53 }
 0x49c   : > { %v2023_v56 = vpop.f32.mrb[32].mxu1 }
 0x49d   : > { %v1520_v11 = vadd.f32 %v2023_v56, %v1428_v10  ;;  %v1511_v12 = vpop.f32.mrb[33].mxu1 }
 0x49e   : > { %v1512_v13 = vadd.f32 %v1511_v12, %v1428_v10  ;;  %v2024_v14 = vpop.f32.mrb[34].mxu1 }
 0x49f   : > { %1544 = vst [vmem:[%s202_s22 + $0x10] sm:$0xff] %v1520_v11  ;;  %v1523_v15 = vadd.f32 %v2024_v14, %v1428_v10  ;;  %v1514_v16 = vpop.f32.mrb[35].mxu1 }
 0x4a0   : > { %1542 = vst [vmem:[%s202_s22] sm:$0xff] %v1512_v13  ;;  %v1515_v17 = vadd.f32 %v1514_v16, %v1428_v10 }
 0x4a1   : > { %1545 = vst [vmem:[%s202_s22 + $0x18] sm:$0xff] %v1523_v15 }
 0x4a2   : > { %1543 = vst [vmem:[%s202_s22 + $0x8] sm:$0xff] %v1515_v17 }
 0x4ac   : > { %v2027_v20 = vpop.f32.mrb[36].mxu1 }
 0x4ad   : > { %v1536_v18 = vadd.f32 %v2027_v20, %v1428_v10  ;;  %v1527_v19 = vpop.f32.mrb[37].mxu1 }
 0x4ae   : > { %v1528_v22 = vadd.f32 %v1527_v19, %v1428_v10  ;;  %v2028_v21 = vpop.f32.mrb[38].mxu1 }
 0x4af   : > { %1548 = vst [vmem:[%s202_s22 + $0x30] sm:$0xff] %v1536_v18  ;;  %v1539_v25 = vadd.f32 %v2028_v21, %v1428_v10  ;;  %v1530_v5 = vpop.f32.mrb[39].mxu1 }
 0x4b0   : > { %1546 = vst [vmem:[%s202_s22 + $0x20] sm:$0xff] %v1528_v22  ;;  %v1531_v26 = vadd.f32 %v1530_v5, %v1428_v10 }
 0x4b1   : > { %1549 = vst [vmem:[%s202_s22 + $0x38] sm:$0xff] %v1539_v25 }
 0x4b2   : > { %1547 = vst [vmem:[%s202_s22 + $0x28] sm:$0xff] %v1531_v26 }
 0x4b3 PF: > { %s14_s15 = sadd.s32 1, %s2125_s15  }
 0x4b4   : > { %p11_p4 = scmp.ge.s32.totalorder %s14_s15, 4  }
 0x4b6   :  { %13 = sbr.rel (!%p11_p4) target bundleno = 1 (0x1), region = 69 }

</bundles_post_ra>
